<compile_context>
chip_gen: v5e
topology: v5e:2x2
jax: 0.10.0
libtpu: 0.0.40
codegen_flags: <defaults>
</compile_context>

<pallas_src>
import math

import jax
import jax.numpy as jnp
from jax.experimental import pallas as pl
from jax.experimental.pallas import tpu as pltpu

LN_EPS = 1e-5                      # PyTorch nn.LayerNorm default
_INV_SQRT2 = 1.0 / math.sqrt(2.0)  # exact-erf GELU (nn.GELU() default)

_VMEM_LIMIT_BYTES = 60 * 1024 * 1024   # <= v7x 64 MiB physical; >> scoped defaults
_VMEM_BUDGET = 44 * 1024 * 1024        # planning budget (headroom under the limit)


def _round_up(x, m):
    return ((x + m - 1) // m) * m


def _gelu_exact(h):
    # Exact erf GELU in f32 (matches nn.GELU()).  If a bundle profile shows the
    # VALU slot binding, a bf16 / tanh-approx variant would route this to the
    # EUP slot instead -- keep f32 here for bit-level fidelity to the module.
    return 0.5 * h * (1.0 + jax.lax.erf(h * _INV_SQRT2))


# --------------------------------------------------------------------------
# Kernel A: full weight residency.  Grid = (token_tiles,).  Weight block
# indices are constant so w1/w2/b1/b2 are fetched from HBM exactly once.
# --------------------------------------------------------------------------
def ffn_kernel_resident(x_ref, w1_ref, b1_ref, w2_ref, b2_ref, o_ref):
    x = x_ref[...].astype(jnp.float32)
    mean = jnp.mean(x, axis=-1, keepdims=True)
    var = jnp.mean((x - mean) ** 2, axis=-1, keepdims=True)
    xn = ((x - mean) * jax.lax.rsqrt(var + LN_EPS)).astype(w1_ref.dtype)

    h = jnp.dot(xn, w1_ref[...], preferred_element_type=jnp.float32)
    h = h + b1_ref[...].astype(jnp.float32)
    h = _gelu_exact(h)

    y = jnp.dot(h.astype(w2_ref.dtype), w2_ref[...], preferred_element_type=jnp.float32)
    o_ref[...] = (y + b2_ref[...].astype(jnp.float32)).astype(o_ref.dtype)


# --------------------------------------------------------------------------
# Kernel B: streamed weight slices.  Grid = (token_tiles, hidden_tiles);
# axis 1 is the hidden-dim reduction.  The normalized tile is cached in VMEM
# scratch and reused across k; the first partial product overwrites the
# accumulator (no zero-fill pass).
# --------------------------------------------------------------------------
def ffn_kernel_streamed(x_ref, w1_ref, b1_ref, w2_ref, b2_ref, o_ref,
                        acc_ref, xn_ref):
    k = pl.program_id(1)

    @pl.when(k == 0)
    def _layernorm():
        x = x_ref[...].astype(jnp.float32)
        mean = jnp.mean(x, axis=-1, keepdims=True)
        var = jnp.mean((x - mean) ** 2, axis=-1, keepdims=True)
        xn_ref[...] = ((x - mean) * jax.lax.rsqrt(var + LN_EPS)).astype(xn_ref.dtype)

    h = jnp.dot(xn_ref[...], w1_ref[...], preferred_element_type=jnp.float32)
    h = h + b1_ref[...].astype(jnp.float32)
    h = _gelu_exact(h)
    partial = jnp.dot(h.astype(w2_ref.dtype), w2_ref[...],
                      preferred_element_type=jnp.float32)

    @pl.when(k == 0)
    def _first():
        acc_ref[...] = partial            # overwrite: saves a zero-fill store

    @pl.when(k > 0)
    def _accumulate():
        acc_ref[...] += partial

    @pl.when(k == pl.num_programs(1) - 1)
    def _finalize():
        o_ref[...] = (acc_ref[...] + b2_ref[...].astype(jnp.float32)).astype(o_ref.dtype)


def feed_forward(x, gamma, beta, w1, b1, w2, b2, *, tm=None, tk_h=None):
    """x: (..., dim) -> (..., dim). Fused LayerNorm + MLP Pallas kernel.

    Matmuls run in the dtype of w1/w2 (pass bf16 weights/activations for peak
    v6e/v7x MXU throughput); accumulation is always f32.
    """
    orig_shape = x.shape
    dim = orig_shape[-1]
    hidden = w1.shape[1]
    out_dtype = x.dtype
    compute_dtype = w1.dtype
    ws = jnp.dtype(compute_dtype).itemsize
    xs = jnp.dtype(x.dtype).itemsize
    osz = jnp.dtype(out_dtype).itemsize

    # --- Fold the LayerNorm affine into the first linear layer (free). ---
    gamma_f = gamma.astype(jnp.float32)
    beta_f = beta.astype(jnp.float32)
    w1_f = w1.astype(jnp.float32)
    w1p = (gamma_f[:, None] * w1_f).astype(compute_dtype)
    b1p = (beta_f @ w1_f + b1.astype(jnp.float32)).astype(compute_dtype)
    w2c = w2.astype(compute_dtype)
    b2c = b2.astype(compute_dtype)

    x2 = x.reshape(-1, dim)
    T = x2.shape[0]

    # --- VMEM working-set estimate for a (token_tile, hidden_tile) config. ---
    def _working_set(tm_c, tk_c):
        weights = 2 * (dim * tk_c + tk_c * dim + tk_c + dim) * ws  # double-buffered
        io_tiles = 2 * tm_c * dim * (xs + osz)                     # x / out, double-buffered
        scratch = tm_c * dim * (4 + ws)                            # f32 acc + cached xn
        interm = 2 * tm_c * tk_c * 4                               # hidden-activation temps
        return weights + io_tiles + scratch + interm

    # --- Tile selection: weight residency first, else stream large slices. ---
    if tk_h is None:
        if tm is not None:
            if _working_set(tm, hidden) <= _VMEM_BUDGET:
                tk_h = hidden
            else:
                for cand in (1024, 512, 256, 128):   # 128 only as a last resort
                    if hidden % cand == 0 and _working_set(tm, cand) <= _VMEM_BUDGET:
                        tk_h = cand
                        break
                if tk_h is None:
                    tk_h = hidden
        else:
            for tm_c in (1024, 512, 256, 128, 64, 32, 16, 8):
                if _working_set(tm_c, hidden) <= _VMEM_BUDGET:
                    tm, tk_h = tm_c, hidden
                    break
            if tk_h is None:
                tm = 512                              # amortize weight re-streaming
                for cand in (1024, 512, 256, 128):
                    if hidden % cand == 0 and _working_set(tm, cand) <= _VMEM_BUDGET:
                        tk_h = cand
                        break
                if tk_h is None:
                    tk_h = 256 if hidden % 256 == 0 else hidden
    if tm is None:
        tm = 256 if tk_h == hidden else 512
    assert hidden % tk_h == 0, "hidden_dim must be divisible by tk_h"

    # --- Token tile: sublane aligned, padded token count, >=2 tiles when
    #     possible so both v7x TensorCores get work on the parallel axis. ---
    tm_eff = max(8, (min(tm, _round_up(T, 8)) // 8) * 8)
    while tm_eff > 8 and -(-T // tm_eff) < 2:
        tm_eff = max(8, ((tm_eff // 2) // 8) * 8)
    T_pad = _round_up(T, tm_eff)
    if T_pad != T:
        x2 = jnp.pad(x2, ((0, T_pad - T), (0, 0)))   # zero rows: LN stays finite

    b1_2 = b1p.reshape(1, hidden)
    b2_2 = b2c.reshape(1, dim)
    n_i = T_pad // tm_eff
    n_k = hidden // tk_h

    if n_k == 1:
        # ---------------- Weight-resident path ----------------
        out = pl.pallas_call(
            ffn_kernel_resident,
            out_shape=jax.ShapeDtypeStruct((T_pad, dim), out_dtype),
            grid_spec=pltpu.PrefetchScalarGridSpec(
                num_scalar_prefetch=0,
                grid=(n_i,),
                in_specs=[
                    pl.BlockSpec((tm_eff, dim), lambda i: (i, 0)),   # x tile
                    pl.BlockSpec((dim, hidden), lambda i: (0, 0)),   # w1 (constant -> 1 DMA)
                    pl.BlockSpec((1, hidden), lambda i: (0, 0)),     # b1
                    pl.BlockSpec((hidden, dim), lambda i: (0, 0)),   # w2 (constant -> 1 DMA)
                    pl.BlockSpec((1, dim), lambda i: (0, 0)),        # b2
                ],
                out_specs=pl.BlockSpec((tm_eff, dim), lambda i: (i, 0)),
            ),
            compiler_params=pltpu.CompilerParams(
                dimension_semantics=("parallel",),
                vmem_limit_bytes=_VMEM_LIMIT_BYTES,
            ),
        )(x2, w1p, b1_2, w2c, b2_2)
    else:
        # ---------------- Streamed-weights path ----------------
        # Serpentine k ordering: odd token tiles walk the hidden slices
        # backwards so the tile-boundary slice is reused without a new DMA.
        def _serp(i, k):
            return k + (i % 2) * (n_k - 1 - 2 * k)

        out = pl.pallas_call(
            ffn_kernel_streamed,
            out_shape=jax.ShapeDtypeStruct((T_pad, dim), out_dtype),
            grid_spec=pltpu.PrefetchScalarGridSpec(
                num_scalar_prefetch=0,
                grid=(n_i, n_k),
                in_specs=[
                    pl.BlockSpec((tm_eff, dim), lambda i, k: (i, 0)),        # x tile
                    pl.BlockSpec((dim, tk_h), lambda i, k: (0, _serp(i, k))),  # w1 slice
                    pl.BlockSpec((1, tk_h), lambda i, k: (0, _serp(i, k))),    # b1 slice
                    pl.BlockSpec((tk_h, dim), lambda i, k: (_serp(i, k), 0)),  # w2 slice
                    pl.BlockSpec((1, dim), lambda i, k: (0, 0)),             # b2
                ],
                out_specs=pl.BlockSpec((tm_eff, dim), lambda i, k: (i, 0)),
                scratch_shapes=[
                    pltpu.VMEM((tm_eff, dim), jnp.float32),     # f32 accumulator
                    pltpu.VMEM((tm_eff, dim), compute_dtype),   # cached normalized tile
                ],
            ),
            compiler_params=pltpu.CompilerParams(
                dimension_semantics=("parallel", "arbitrary"),
                vmem_limit_bytes=_VMEM_LIMIT_BYTES,
            ),
        )(x2, w1p, b1_2, w2c, b2_2)

    return out[:T].reshape(orig_shape)


def _reference(x, gamma, beta, w1, b1, w2, b2):
    """Plain-JAX f32 reference (matches PyTorch semantics)."""
    xf = x.astype(jnp.float32)
    mean = jnp.mean(xf, axis=-1, keepdims=True)
    var = jnp.mean((xf - mean) ** 2, axis=-1, keepdims=True)
    xn = (xf - mean) / jnp.sqrt(var + LN_EPS) * gamma.astype(jnp.float32) + beta.astype(jnp.float32)
    h = xn @ w1.astype(jnp.float32) + b1.astype(jnp.float32)
    h = 0.5 * h * (1.0 + jax.lax.erf(h * _INV_SQRT2))
    y = h @ w2.astype(jnp.float32) + b2.astype(jnp.float32)
    return y


if __name__ == "__main__":
    # Small ViT-ish shapes (lane-dense feature axis): batch=2, seq=8,
    # dim=128, hidden=512.
    B, N, DIM, HIDDEN = 2, 8, 128, 512
    key = jax.random.PRNGKey(0)
    kx, kg, kb, kw1, kb1, kw2, kb2 = jax.random.split(key, 7)

    x = jax.random.normal(kx, (B, N, DIM), dtype=jnp.float32)

    gamma = 1.0 + 0.1 * jax.random.normal(kg, (DIM,), dtype=jnp.float32)
    beta = 0.1 * jax.random.normal(kb, (DIM,), dtype=jnp.float32)
    w1 = jax.random.normal(kw1, (DIM, HIDDEN), dtype=jnp.float32) * (1.0 / math.sqrt(DIM))
    b1 = 0.01 * jax.random.normal(kb1, (HIDDEN,), dtype=jnp.float32)
    w2 = jax.random.normal(kw2, (HIDDEN, DIM), dtype=jnp.float32) * (1.0 / math.sqrt(HIDDEN))
    b2 = 0.01 * jax.random.normal(kb2, (DIM,), dtype=jnp.float32)

    ref = _reference(x, gamma, beta, w1, b1, w2, b2)

    # 1) Auto config (weight-resident fused path), f32.
    out = feed_forward(x, gamma, beta, w1, b1, w2, b2)
    out = jax.block_until_ready(out)
    assert out.shape == x.shape
    assert jnp.allclose(out, ref, atol=1e-3, rtol=1e-3), "f32 resident path mismatch"

    # 2) Forced streamed path (2 hidden-reduction steps, serpentine ordering,
    #    accumulator overwrite/accumulate/finalize logic exercised).
    out_s = feed_forward(x, gamma, beta, w1, b1, w2, b2, tm=8, tk_h=256)
    out_s = jax.block_until_ready(out_s)
    assert out_s.shape == x.shape
    assert jnp.allclose(out_s, ref, atol=1e-3, rtol=1e-3), "f32 streamed path mismatch"

    # 3) bf16 weights/activations (bf16 MXU inputs, f32 accumulation) —
    #    looser tolerance vs the f32 reference.
    to_bf16 = lambda a: a.astype(jnp.bfloat16)
    out_bf16 = feed_forward(
        to_bf16(x), to_bf16(gamma), to_bf16(beta),
        to_bf16(w1), to_bf16(b1), to_bf16(w2), to_bf16(b2),
    )
    out_bf16 = jax.block_until_ready(out_bf16)
    assert out_bf16.shape == x.shape
    assert out_bf16.dtype == jnp.bfloat16
    assert jnp.allclose(out_bf16.astype(jnp.float32), ref, atol=8e-2, rtol=8e-2), \
        "bf16 mismatch vs reference"

    print("KERNEL_OK")
</pallas_src>

<mosaic_0001>
module attributes {stable_mosaic.version = 11 : i64} {
  func.func @ffn_kernel_resident(%arg0: i32, %arg1: memref<8x128xf32, #tpu.memory_space<vmem>>, %arg2: memref<128x512xf32, #tpu.memory_space<vmem>>, %arg3: memref<1x512xf32, #tpu.memory_space<vmem>>, %arg4: memref<512x128xf32, #tpu.memory_space<vmem>>, %arg5: memref<1x128xf32, #tpu.memory_space<vmem>>, %arg6: memref<8x128xf32, #tpu.memory_space<vmem>>) attributes {dimension_semantics = [#tpu.dimension_semantics<parallel>], iteration_bounds = array<i64: 2>, scalar_prefetch = 0 : i64, scratch_operands = 0 : i64, tpu.core_type = #tpu.core_type<tc>, window_params = [{transform_indices = @transform_0, window_bounds = array<i64: 8, 128>}, {pipeline_mode = #tpu.pipeline_mode<synchronous>, transform_indices = @transform_1, window_bounds = array<i64: 128, 512>}, {pipeline_mode = #tpu.pipeline_mode<synchronous>, transform_indices = @transform_2, window_bounds = array<i64: 1, 512>}, {pipeline_mode = #tpu.pipeline_mode<synchronous>, transform_indices = @transform_3, window_bounds = array<i64: 512, 128>}, {pipeline_mode = #tpu.pipeline_mode<synchronous>, transform_indices = @transform_4, window_bounds = array<i64: 1, 128>}, {transform_indices = @transform_5, window_bounds = array<i64: 8, 128>}]} {
    %c0 = arith.constant 0 : index
    %c0_0 = arith.constant 0 : index
    %0 = vector.load %arg1[%c0, %c0_0] : memref<8x128xf32, #tpu.memory_space<vmem>>, vector<8x128xf32>
    %cst = arith.constant dense<0.000000e+00> : vector<8xf32>
    %1 = vector.multi_reduction <add>, %0, %cst [1] : vector<8x128xf32> to vector<8xf32>
    %2 = vector.shape_cast %1 : vector<8xf32> to vector<8x1xf32>
    %cst_1 = arith.constant 1.280000e+02 : f32
    %3 = vector.broadcast %cst_1 : f32 to vector<8x1xf32>
    %4 = arith.divf %2, %3 : vector<8x1xf32>
    %5 = vector.broadcast %4 : vector<8x1xf32> to vector<8x128xf32>
    %6 = arith.subf %0, %5 : vector<8x128xf32>
    %7 = arith.mulf %6, %6 : vector<8x128xf32>
    %cst_2 = arith.constant dense<0.000000e+00> : vector<8xf32>
    %8 = vector.multi_reduction <add>, %7, %cst_2 [1] : vector<8x128xf32> to vector<8xf32>
    %9 = vector.shape_cast %8 : vector<8xf32> to vector<8x1xf32>
    %cst_3 = arith.constant 1.280000e+02 : f32
    %10 = vector.broadcast %cst_3 : f32 to vector<8x1xf32>
    %11 = arith.divf %9, %10 : vector<8x1xf32>
    %12 = vector.broadcast %4 : vector<8x1xf32> to vector<8x128xf32>
    %13 = arith.subf %0, %12 : vector<8x128xf32>
    %cst_4 = arith.constant 9.99999974E-6 : f32
    %14 = vector.broadcast %cst_4 : f32 to vector<8x1xf32>
    %15 = arith.addf %11, %14 : vector<8x1xf32>
    %16 = math.rsqrt %15 : vector<8x1xf32>
    %17 = vector.broadcast %16 : vector<8x1xf32> to vector<8x128xf32>
    %18 = arith.mulf %13, %17 : vector<8x128xf32>
    %c0_5 = arith.constant 0 : index
    %c0_6 = arith.constant 0 : index
    %19 = vector.load %arg2[%c0_5, %c0_6] : memref<128x512xf32, #tpu.memory_space<vmem>>, vector<128x512xf32>
    %cst_7 = arith.constant dense<0.000000e+00> : vector<8x512xf32>
    %20 = tpu.matmul %18, %19, %cst_7 {dimension_numbers = #tpu.dot_dimension_numbers<[1], [0], [0], [1], [0, 0, 1, 1], [], []>} : vector<8x128xf32>, vector<128x512xf32>, vector<8x512xf32> -> vector<8x512xf32>
    %c0_8 = arith.constant 0 : index
    %c0_9 = arith.constant 0 : index
    %21 = vector.load %arg3[%c0_8, %c0_9] : memref<1x512xf32, #tpu.memory_space<vmem>>, vector<1x512xf32>
    %22 = vector.broadcast %21 : vector<1x512xf32> to vector<8x512xf32>
    %23 = arith.addf %20, %22 : vector<8x512xf32>
    %cst_10 = arith.constant 5.000000e-01 : f32
    %24 = vector.broadcast %cst_10 : f32 to vector<8x512xf32>
    %25 = arith.mulf %24, %23 : vector<8x512xf32>
    %cst_11 = arith.constant 0.707106769 : f32
    %26 = vector.broadcast %cst_11 : f32 to vector<8x512xf32>
    %27 = arith.mulf %23, %26 : vector<8x512xf32>
    %28 = math.erf %27 : vector<8x512xf32>
    %cst_12 = arith.constant 1.000000e+00 : f32
    %29 = vector.broadcast %cst_12 : f32 to vector<8x512xf32>
    %30 = arith.addf %29, %28 : vector<8x512xf32>
    %31 = arith.mulf %25, %30 : vector<8x512xf32>
    %c0_13 = arith.constant 0 : index
    %c0_14 = arith.constant 0 : index
    %32 = vector.load %arg4[%c0_13, %c0_14] : memref<512x128xf32, #tpu.memory_space<vmem>>, vector<512x128xf32>
    %cst_15 = arith.constant dense<0.000000e+00> : vector<8x128xf32>
    %33 = tpu.matmul %31, %32, %cst_15 {dimension_numbers = #tpu.dot_dimension_numbers<[1], [0], [0], [1], [0, 0, 1, 1], [], []>} : vector<8x512xf32>, vector<512x128xf32>, vector<8x128xf32> -> vector<8x128xf32>
    %c0_16 = arith.constant 0 : index
    %c0_17 = arith.constant 0 : index
    %34 = vector.load %arg5[%c0_16, %c0_17] : memref<1x128xf32, #tpu.memory_space<vmem>>, vector<1x128xf32>
    %35 = vector.broadcast %34 : vector<1x128xf32> to vector<8x128xf32>
    %36 = arith.addf %33, %35 : vector<8x128xf32>
    %c0_18 = arith.constant 0 : index
    %c0_19 = arith.constant 0 : index
    %37 = vector.load %arg6[%c0_18, %c0_19] : memref<8x128xf32, #tpu.memory_space<vmem>>, vector<8x128xf32>
    tpu.vector_store %arg6[%c0_18, %c0_19], %36 {strides = array<i32>} : memref<8x128xf32, #tpu.memory_space<vmem>>, vector<8x128xf32>,
    return
  }
  func.func @transform_0(%arg0: i32) -> (i32, i32) {
    %c0_i32 = arith.constant 0 : i32
    %c0_i32_0 = arith.constant 0 : i32
    return %arg0, %c0_i32 : i32, i32
  }
  func.func @transform_1(%arg0: i32) -> (i32, i32) {
    %c0_i32 = arith.constant 0 : i32
    %c0_i32_0 = arith.constant 0 : i32
    %c0_i32_1 = arith.constant 0 : i32
    return %c0_i32, %c0_i32_0 : i32, i32
  }
  func.func @transform_2(%arg0: i32) -> (i32, i32) {
    %c0_i32 = arith.constant 0 : i32
    %c0_i32_0 = arith.constant 0 : i32
    %c0_i32_1 = arith.constant 0 : i32
    return %c0_i32, %c0_i32_0 : i32, i32
  }
  func.func @transform_3(%arg0: i32) -> (i32, i32) {
    %c0_i32 = arith.constant 0 : i32
    %c0_i32_0 = arith.constant 0 : i32
    %c0_i32_1 = arith.constant 0 : i32
    return %c0_i32, %c0_i32_0 : i32, i32
  }
  func.func @transform_4(%arg0: i32) -> (i32, i32) {
    %c0_i32 = arith.constant 0 : i32
    %c0_i32_0 = arith.constant 0 : i32
    %c0_i32_1 = arith.constant 0 : i32
    return %c0_i32, %c0_i32_0 : i32, i32
  }
  func.func @transform_5(%arg0: i32) -> (i32, i32) {
    %c0_i32 = arith.constant 0 : i32
    %c0_i32_0 = arith.constant 0 : i32
    return %arg0, %c0_i32 : i32, i32
  }
}

</mosaic_0001>

<bundles_post_ra>
// kernel: tpu_custom_call.1
= control target key start
LH: loop header
LB: loop body
LE: loop exit
PB: predicated region body
PF: predicated region fallthrough
CT: control target
= control target key end

     0   :  { %10 = vsyncpa [#allocation3], 0  ;;  %s1564_s0 = inlined_call_operand.hbm [shape: f32[16,128], index: 0, kind: input, shape index: {}]   ;;  %s1565_s1 = inlined_call_operand.hbm [shape: f32[128,512], index: 1, kind: input, shape index: {}]   ;;  %s1566_s2 = inlined_call_operand.hbm [shape: f32[1,512], index: 2, kind: input, shape index: {}]   ;;  %s1567_s3 = inlined_call_operand.hbm [shape: f32[512,128], index: 3, kind: input, shape index: {}]   ;;  %s1568_s4 = inlined_call_operand.vmem [shape: f32[1,128], index: 4, kind: input, shape index: {}]   ;;  %s1569_s5 = inlined_call_operand.hbm [shape: f32[16,128], index: 5, kind: output, shape index: {}]  }
   0x1   :  { %12 = vsyncpa [#allocation3 + $0x1], 0 }
   0x2   :  { %13 = vsyncpa [#allocation6], 0 }
   0x3   :  { %14 = vsyncpa [#allocation9], 0 }
   0x4   :  { %15 = vsyncpa [#allocation4], 0 }
   0x5   :  { %17 = vsyncpa [#allocation4 + $0x1], 0  ;;  %s1263_s18 = smov 0   ;;  %s1265_s19 = smov 0  }
   0x6   :  { %s1267_s20 = smov 0   ;;  %s1269_s21 = smov 0  }
   0x7 LB: > { %s175_s24 = sshll.u32 %s1565_s1, 4  ;;  %s1287_s25 = sadd.s32 4294967295, %s1223_s21   ;;  %s1223_s21 = sphi %s1269_s21, %s1582_s21   ;;  %s1219_s20 = sphi %s1267_s20, %s1581_s20   ;;  %s1215_s19 = sphi %s1265_s19, %s1580_s19   ;;  %s1211_s18 = sphi %s1263_s18, %s1579_s18   ;;  %s176_s24 = int_to_ptr.hbm [resolvable:$true] %s175_s24 }
   0x8   : > { %p913_p0 = scmp.ge.s32.totalorder %s1223_s21, 1  ;;  %p44_p1 = scmp.eq.s32.totalorder %s1287_s25, 0 }
   0x9   : > { %p164_p2 = scmp.lt.s32.totalorder %s1223_s21, 3  ;;  %s1225_s27 = smov [#allocation5]  }
   0xa   : > { %s177_s28 = sshll.u32 %s1225_s27, 4  ;;  %s190_s6 = sshll.u32 %s1566_s2, 4  ;;  %s178_s28 = int_to_ptr.vmem [resolvable:$true] %s177_s28  ;;  %s191_s6 = int_to_ptr.hbm [resolvable:$true] %s190_s6 }
   0xb   : > { %p1292_p3 = pnand %p913_p0, %p164_p2  ;;  %s201_s10 = sshll.u32 %s1567_s3, 4  ;;  %s202_s10 = int_to_ptr.hbm [resolvable:$true] %s201_s10 }
   0xc   : > { %s1226_s11 = smov [#allocation7]   ;;  %s1227_s13 = smov 512  }
   0xd   : > { %p950_p4 = pneg %p1292_p3  ;;  %s192_s12 = sshll.u32 %s1226_s11, 4  ;;  %s193_s12 = int_to_ptr.vmem [resolvable:$true] %s192_s12 }
   0xe   : > { %s1228_s14 = smov 32   ;;  %s1229_s15 = smov [#allocation8]  }
   0xf   : > { %p1304_p6 = pnand %p950_p4, %p44_p1  ;;  %s203_s16 = sshll.u32 %s1229_s15, 4  ;;  %s204_s16 = int_to_ptr.vmem [resolvable:$true] %s203_s16 }
  0x10   : > { %s1230_s17 = smov 128   ;;  %s1231_s22 = smov 8  }
  0x11   : > { %953 = dma.hbm_to_vmem [thread:$0]  (!%p1304_p6), %s176_s24, 8192, %s178_s28, [#allocation6], %s1227_s13, %s1227_s13, %s1228_s14  }
  0x12   : > { %956 = dma.hbm_to_vmem [thread:$0]  (!%p1304_p6), %s191_s6, 64, %s193_s12, [#allocation6]  }
  0x13   : > { %959 = dma.hbm_to_vmem [thread:$0]  (!%p1304_p6), %s202_s10, 8192, %s204_s16, [#allocation9], %s1230_s17, %s1230_s17, %s1231_s22  }
  0x14   : > { %s912_s23 = sadd.s32 4294967294, %s1223_s21   ;;  %s1319_s24 = sadd.s32 1, %s1223_s21  }
  0x15   : > { %s30_s27 = sadd.s32 1, %s1219_s20  ;;  %s27_s28 = ssub.s32 %s1223_s21, %s1319_s24 }
  0x16   : > { %p37_p7 = scmp.ne.s32.totalorder %s1219_s20, %s1215_s19  ;;  %p28_p8 = scmp.eq.s32.totalorder %s27_s28, 0 }
  0x17   : > { %p38_p9 = scmp.eq.s32.totalorder %s1223_s21, 0  ;;  %p43_p10 = scmp.ne.s32.totalorder %s1215_s19, %s1211_s18 }
  0x18   : > { %p151_p11 = scmp.eq.s32.totalorder %s1287_s25, 1  ;;  %p157_p0 = scmp.eq.s32.totalorder %s912_s23, 1 }
  0x19   : > { %s1331_s29 = scalar_select %p28_p8, %s1219_s20, %s30_s27  }
  0x1a   : > { %p1335_p12 = por %p44_p1, %p43_p10  ;;  %p1339_p13 = por %p151_p11, %p37_p7 }
  0x1b   : > { %p39_p2 = por %p38_p9, %p37_p7  ;;  %s220_s7 = sand.u32 1, %s1219_s20  }
  0x1c   : > { %p1344_p4 = por %p157_p0, %p43_p10  ;;  %p971_p6 = scmp.lt.s32.totalorder %s1223_s21, 2 }
  0x1d   : > { %s918_s9 = sshll.u32 %s220_s7, 3  ;;  %s919_s10 = sshll.u32 %s1223_s21, 3 }
  0x1e   : > { %s228_s13 = scalar_lea.hbm %s1564_s0, %s919_s10  ;;  %s224_s15 = scalar_lea.vmem [#allocation2], %s918_s9 }
  0x1f   : > { %s230_s14 = sshll.u32 %s228_s13, 4  ;;  %s232_s16 = sshll.u32 %s224_s15, 4  ;;  %s231_s14 = int_to_ptr.hbm [resolvable:$true] %s230_s14  ;;  %s233_s16 = int_to_ptr.vmem [resolvable:$true] %s232_s16 }
  0x20   : > { %p1353_p8 = pnand %p971_p6, %p39_p2  ;;  %s221_s22 = scalar_lea.sflag [#allocation3], %s220_s7 }
  0x21   : > { %s1119_s23 = sshra.s32 %s231_s14, 4  ;;  %s1126_s9 = scalar_lea.hbm %s1564_s0, 16  ;;  %s1120_s23 = int_to_ptr.hbm [resolvable:$true] %s1119_s23 }
  0x22   : > { %s1121_s27 = scalar_lea.hbm %s1120_s23, 8  ;;  %p1123_p9 = pneg %p1353_p8 }
  0x23   : > { %p1122_p7 = scmp.ne.s32.totalorder %s1120_s23, %s1121_s27  ;;  %p1127_p0 = scmp.lt.s32.totalorder %s1120_s23, %s1564_s0 }
  0x24   : > { %p1128_p2 = scmp.lt.s32.totalorder %s1126_s9, %s1121_s27 }
  0x25   : > { %p1124_p10 = pnand %p1123_p9, %p1122_p7 }
  0x26   : > { %p1129_p6 = por %p1128_p2, %p1127_p0 }
  0x27   : > { %p1125_p11 = pneg %p1124_p10 }
  0x29   : > { %p1130_p5 = pnand %p1129_p6, %p1125_p11 }
  0x2b   : > { %1133 = shalt.err (!%p1130_p5)
}
  0x2c   : > { %963 = dma.hbm_to_vmem [thread:$0]  (!%p1353_p8), %s231_s14, 128, %s233_s16, %s221_s22  }
  0x2d   : > { %241 = sbr.rel (%p1292_p3) target bundleno = 645 (0x285), region = 40  ;;  %s1370_s7 = sand.u32 (!%p1292_p3), 1, %s1215_s19  }
  0x2e   : > { %s921_s13 = sshll.u32 (!%p1292_p3), %s1370_s7, 3  ;;  %s244_s15 = scalar_lea.sflag (!%p1292_p3), [#allocation3], %s1370_s7 }
  0x2f   : > { %s247_s23 = scalar_lea.vmem (!%p1292_p3), [#allocation2], %s921_s13 }
  0x32   : > { %1194 = dma.done.wait (%p1335_p12), %s244_s15, 128  }
  0x33   : > { %1196 = vsyncadd (%p1335_p12), %s244_s15, 4294967168 }
  0x34   : > { %1198 = dma.done.wait (%p44_p1), [#allocation6], 8256  }
  0x35   : > { %1200 = vsyncadd (%p44_p1), [#allocation6], 4294959040 }
  0x36   : > { %1202 = dma.done.wait (%p44_p1), [#allocation9], 8192  }
  0x37   : > { %1204 = vsyncadd (%p44_p1), [#allocation9], 4294959104  ;;  %v290_v0 = vld [vmem:[%s247_s23] sm:$0xff]  ;;  %v1232_v1 = vmov 128.0   ;;  %v378_v2 = vld [vmem:[#allocation5 + $0x1e0] sm:$0xff]  ;;  %s931_s14 = sshll.u32 %s1287_s25, 3 }
  0x38   : > { %291 = vadd.xlane.f32.xlu0 %v290_v0  ;;  %1017 = vrcp.f32 %v1232_v1  ;;  %v379_v3 = vld [vmem:[#allocation5 + $0x1e8] sm:$0xff]  ;;  %v380_v4 = vld [vmem:[#allocation5 + $0x1f0] sm:$0xff]  ;;  %392 = vmatpush.msra.mxu0 %v378_v2  ;;  %v381_v5 = vld [vmem:[#allocation5 + $0x1f8] sm:$0xff]  ;;  %s808_s22 = scalar_lea.hbm %s1569_s5, %s931_s14  ;;  %s289_s27 = scalar_lea.vmem [#allocation10], %s921_s13 }
  0x39   : > { %412 = vmatpush.msra.mxu1 %v379_v3  ;;  %v374_v6 = vld [vmem:[#allocation5 + $0x1c0] sm:$0xff]  ;;  %v375_v7 = vld [vmem:[#allocation5 + $0x1c8] sm:$0xff]  ;;  %432 = vmatpush.msra.mxu2 %v380_v4  ;;  %v376_v8 = vld [vmem:[#allocation5 + $0x1d0] sm:$0xff]  ;;  %s810_s28 = sshll.u32 %s289_s27, 4  ;;  %s812_s10 = sshll.u32 %s808_s22, 4  ;;  %s811_s28 = int_to_ptr.vmem [resolvable:$true] %s810_s28  ;;  %s813_s10 = int_to_ptr.hbm [resolvable:$true] %s812_s10 }
  0x3a   : > { %452 = vmatpush.msra.mxu3 %v381_v5  ;;  %v377_v9 = vld [vmem:[#allocation5 + $0x1d8] sm:$0xff]  ;;  %v370_v10 = vld [vmem:[#allocation5 + $0x1a0] sm:$0xff]  ;;  %393 = vmatpush.msra.mxu0 %v374_v6  ;;  %v371_v11 = vld [vmem:[#allocation5 + $0x1a8] sm:$0xff]  ;;  %s798_s9 = scalar_lea.sflag [#allocation4], %s1370_s7  ;;  %s1163_s25 = sshra.s32 %s813_s10, 4  ;;  %s1164_s25 = int_to_ptr.hbm [resolvable:$true] %s1163_s25 }
  0x3b   : > { %413 = vmatpush.msra.mxu1 %v375_v7  ;;  %v372_v12 = vld [vmem:[#allocation5 + $0x1b0] sm:$0xff]  ;;  %v373_v13 = vld [vmem:[#allocation5 + $0x1b8] sm:$0xff]  ;;  %433 = vmatpush.msra.mxu2 %v376_v8  ;;  %v366_v15 = vld [vmem:[#allocation5 + $0x180] sm:$0xff]  ;;  %s1165_s11 = scalar_lea.hbm %s1164_s25, 8  ;;  %s1169_s23 = scalar_lea.hbm %s1569_s5, 16 }
  0x3c   : > { %453 = vmatpush.msra.mxu3 %v377_v9  ;;  %v367_v16 = vld [vmem:[#allocation5 + $0x188] sm:$0xff]  ;;  %394 = vmatpush.msra.mxu0 %v370_v10  ;;  %v368_v17 = vld [vmem:[#allocation5 + $0x190] sm:$0xff]  ;;  %v369_v18 = vld [vmem:[#allocation5 + $0x198] sm:$0xff]  ;;  %p1166_p1 = scmp.ne.s32.totalorder %s1164_s25, %s1165_s11  ;;  %p1170_p12 = scmp.lt.s32.totalorder %s1164_s25, %s1569_s5 }
  0x3d   : > { %414 = vmatpush.msra.mxu1 %v371_v11  ;;  %434 = vmatpush.msra.mxu2 %v372_v12  ;;  %v362_v28 = vld [vmem:[#allocation5 + $0x160] sm:$0xff]  ;;  %v363_v29 = vld [vmem:[#allocation5 + $0x168] sm:$0xff]  ;;  %v364_v30 = vld [vmem:[#allocation5 + $0x170] sm:$0xff]  ;;  %p1171_p8 = scmp.lt.s32.totalorder %s1169_s23, %s1165_s11 }
  0x3e   : > { %v1018_v14 = vpop.eup %1017  ;;  %454 = vmatpush.msra.mxu3 %v373_v13  ;;  %395 = vmatpush.msra.mxu0 %v366_v15  ;;  %v365_v31 = vld [vmem:[#allocation5 + $0x178] sm:$0xff]  ;;  %v358_v32 = vld [vmem:[#allocation5 + $0x140] sm:$0xff]  ;;  %v359_v33 = vld [vmem:[#allocation5 + $0x148] sm:$0xff]  ;;  %p1167_p3 = pnand %p1166_p1, %p1339_p13 }
  0x3f   : > { %v294_v19 = vmul.f32 128.0, %v1018_v14  ;;  %415 = vmatpush.msra.mxu1 %v367_v16  ;;  %435 = vmatpush.msra.mxu2 %v368_v17  ;;  %vm298_vm0 = vweird.f32 %v1018_v14  ;;  %v360_v34 = vld [vmem:[#allocation5 + $0x150] sm:$0xff]  ;;  %v361_v35 = vld [vmem:[#allocation5 + $0x158] sm:$0xff]  ;;  %v354_v36 = vld [vmem:[#allocation5 + $0x120] sm:$0xff]  ;;  %p1172_p7 = por %p1171_p8, %p1170_p12 }
  0x40   : > { %455 = vmatpush.msra.mxu3 %v369_v18  ;;  %396 = vmatpush.msra.mxu0 %v362_v28  ;;  %v355_v37 = vld [vmem:[#allocation5 + $0x128] sm:$0xff]  ;;  %v356_v38 = vld [vmem:[#allocation5 + $0x130] sm:$0xff]  ;;  %v357_v39 = vld [vmem:[#allocation5 + $0x138] sm:$0xff]  ;;  %p1168_p5 = pneg %p1167_p3 }
  0x41   : > { %v295_v20 = vsub.f32 1.0, %v294_v19  ;;  %416 = vmatpush.msra.mxu1 %v363_v29  ;;  %436 = vmatpush.msra.mxu2 %v364_v30  ;;  %v350_v40 = vld [vmem:[#allocation5 + $0x100] sm:$0xff]  ;;  %v351_v41 = vld [vmem:[#allocation5 + $0x108] sm:$0xff]  ;;  %v352_v42 = vld [vmem:[#allocation5 + $0x110] sm:$0xff] }
  0x42   : > { %456 = vmatpush.msra.mxu3 %v365_v31  ;;  %397 = vmatpush.msra.mxu0 %v358_v32  ;;  %v353_v43 = vld [vmem:[#allocation5 + $0x118] sm:$0xff]  ;;  %v346_v44 = vld [vmem:[#allocation5 + $0xe0] sm:$0xff]  ;;  %v347_v45 = vld [vmem:[#allocation5 + $0xe8] sm:$0xff]  ;;  %p1173_p9 = pnand %p1172_p7, %p1168_p5 }
  0x43   : > { %v296_v21 = vmul.f32 %v1018_v14, %v295_v20  ;;  %417 = vmatpush.msra.mxu1 %v359_v33  ;;  %437 = vmatpush.msra.mxu2 %v360_v34  ;;  %v348_v46 = vld [vmem:[#allocation5 + $0xf0] sm:$0xff]  ;;  %v349_v47 = vld [vmem:[#allocation5 + $0xf8] sm:$0xff]  ;;  %v342_v48 = vld [vmem:[#allocation5 + $0xc0] sm:$0xff] }
  0x44   : > { %457 = vmatpush.msra.mxu3 %v361_v35  ;;  %398 = vmatpush.msra.mxu0 %v354_v36  ;;  %v343_v49 = vld [vmem:[#allocation5 + $0xc8] sm:$0xff]  ;;  %v344_v50 = vld [vmem:[#allocation5 + $0xd0] sm:$0xff]  ;;  %v345_v51 = vld [vmem:[#allocation5 + $0xd8] sm:$0xff] }
  0x45   : > { %v297_v22 = vadd.f32 %v1018_v14, %v296_v21  ;;  %418 = vmatpush.msra.mxu1 %v355_v37  ;;  %438 = vmatpush.msra.mxu2 %v356_v38  ;;  %v338_v52 = vld [vmem:[#allocation5 + $0xa0] sm:$0xff]  ;;  %v339_v53 = vld [vmem:[#allocation5 + $0xa8] sm:$0xff]  ;;  %v340_v54 = vld [vmem:[#allocation5 + $0xb0] sm:$0xff] }
  0x46   : > { %458 = vmatpush.msra.mxu3 %v357_v39  ;;  %399 = vmatpush.msra.mxu0 %v350_v40  ;;  %v341_v55 = vld [vmem:[#allocation5 + $0xb8] sm:$0xff]  ;;  %v334_v56 = vld [vmem:[#allocation5 + $0x80] sm:$0xff]  ;;  %v335_v57 = vld [vmem:[#allocation5 + $0x88] sm:$0xff] }
  0x47   : > { %v1388_v23 = vsel %vm298_vm0, %v1018_v14, %v297_v22  ;;  %419 = vmatpush.msra.mxu1 %v351_v41  ;;  %439 = vmatpush.msra.mxu2 %v352_v42  ;;  %v336_v58 = vld [vmem:[#allocation5 + $0x90] sm:$0xff]  ;;  %v337_v59 = vld [vmem:[#allocation5 + $0x98] sm:$0xff]  ;;  %v330_v60 = vld [vmem:[#allocation5 + $0x60] sm:$0xff] }
  0x48   : > { %459 = vmatpush.msra.mxu3 %v353_v43  ;;  %400 = vmatpush.msra.mxu0 %v346_v44  ;;  %v331_v61 = vld [vmem:[#allocation5 + $0x68] sm:$0xff]  ;;  %v332_v62 = vld [vmem:[#allocation5 + $0x70] sm:$0xff]  ;;  %v333_v63 = vld [vmem:[#allocation5 + $0x78] sm:$0xff] }
  0x49   : > { %420 = vmatpush.msra.mxu1 %v347_v45  ;;  %440 = vmatpush.msra.mxu2 %v348_v46  ;;  %v327_v1 = vld [vmem:[#allocation5 + $0x48] sm:$0xff]  ;;  %v328_v2 = vld [vmem:[#allocation5 + $0x50] sm:$0xff]  ;;  %v329_v3 = vld [vmem:[#allocation5 + $0x58] sm:$0xff] }
  0x4a   : > { %460 = vmatpush.msra.mxu3 %v349_v47  ;;  %401 = vmatpush.msra.mxu0 %v342_v48  ;;  %v322_v4 = vld [vmem:[#allocation5 + $0x20] sm:$0xff]  ;;  %v323_v5 = vld [vmem:[#allocation5 + $0x28] sm:$0xff]  ;;  %v324_v6 = vld [vmem:[#allocation5 + $0x30] sm:$0xff] }
  0x4b   : > { %421 = vmatpush.msra.mxu1 %v343_v49  ;;  %441 = vmatpush.msra.mxu2 %v344_v50  ;;  %v325_v7 = vld [vmem:[#allocation5 + $0x38] sm:$0xff]  ;;  %v318_v8 = vld [vmem:[#allocation5] sm:$0xff]  ;;  %v319_v9 = vld [vmem:[#allocation5 + $0x8] sm:$0xff] }
  0x4c   : > { %461 = vmatpush.msra.mxu3 %v345_v51  ;;  %402 = vmatpush.msra.mxu0 %v338_v52  ;;  %v320_v10 = vld [vmem:[#allocation5 + $0x10] sm:$0xff]  ;;  %v321_v11 = vld [vmem:[#allocation5 + $0x18] sm:$0xff] }
  0x4d   : > { %422 = vmatpush.msra.mxu1 %v339_v53  ;;  %442 = vmatpush.msra.mxu2 %v340_v54  ;;  %v663_v34 = vld [vmem:[#allocation8 + $0x78] sm:$0xff]  ;;  %v662_v38 = vld [vmem:[#allocation8 + $0x70] sm:$0xff]  ;;  %v661_v44 = vld [vmem:[#allocation8 + $0x68] sm:$0xff] }
  0x4e   : > { %462 = vmatpush.msra.mxu3 %v341_v55  ;;  %403 = vmatpush.msra.mxu0 %v334_v56  ;;  %v679_v35 = vld [vmem:[#allocation8 + $0xf8] sm:$0xff]  ;;  %v678_v39 = vld [vmem:[#allocation8 + $0xf0] sm:$0xff]  ;;  %v677_v45 = vld [vmem:[#allocation8 + $0xe8] sm:$0xff] }
  0x4f   : > { %423 = vmatpush.msra.mxu1 %v335_v57  ;;  %443 = vmatpush.msra.mxu2 %v336_v58 }
  0x50   : > { %463 = vmatpush.msra.mxu3 %v337_v59  ;;  %404 = vmatpush.msra.mxu0 %v330_v60  ;;  %v660_v59 = vld [vmem:[#allocation8 + $0x60] sm:$0xff] }
  0x51   : > { %424 = vmatpush.msra.mxu1 %v331_v61  ;;  %444 = vmatpush.msra.mxu2 %v332_v62  ;;  %v676_v60 = vld [vmem:[#allocation8 + $0xe0] sm:$0xff] }
  0x52   : > { %464 = vmatpush.msra.mxu3 %v333_v63 }
  0x53   : > { %425 = vmatpush.msra.mxu1 %v327_v1  ;;  %445 = vmatpush.msra.mxu2 %v328_v2  ;;  %v711_v1 = vld [vmem:[#allocation8 + $0x1f8] sm:$0xff] }
  0x54   : > { %465 = vmatpush.msra.mxu3 %v329_v3  ;;  %v659_v2 = vld [vmem:[#allocation8 + $0x58] sm:$0xff] }
  0x55   : > { %426 = vmatpush.msra.mxu1 %v323_v5  ;;  %446 = vmatpush.msra.mxu2 %v324_v6  ;;  %v675_v6 = vld [vmem:[#allocation8 + $0xd8] sm:$0xff] }
  0x56   : > { %466 = vmatpush.msra.mxu3 %v325_v7  ;;  %v694_v7 = vld [vmem:[#allocation8 + $0x170] sm:$0xff] }
  0x57   : > { %427 = vmatpush.msra.mxu1 %v319_v9  ;;  %447 = vmatpush.msra.mxu2 %v320_v10 }
  0x58   : > { %467 = vmatpush.msra.mxu3 %v321_v11 }
  0x59   : > { %736 = vmatpush.msrb.mxu1 %v679_v35 }
  0x5a   : > { %776 = vmatpush.msrb.mxu3 %v711_v1  ;;  %v671_v1 = vld [vmem:[#allocation8 + $0xb8] sm:$0xff] }
  0x5b   : > { %737 = vmatpush.msrb.mxu1 %v678_v39  ;;  %v692_v39 = vld [vmem:[#allocation8 + $0x160] sm:$0xff] }
  0x5d   : > { %738 = vmatpush.msrb.mxu1 %v677_v45  ;;  %v656_v45 = vld [vmem:[#allocation8 + $0x40] sm:$0xff] }
  0x5f   : > { %739 = vmatpush.msrb.mxu1 %v676_v60  ;;  %v707_v60 = vld [vmem:[#allocation8 + $0x1d8] sm:$0xff] }
  0x61   : > { %740 = vmatpush.msrb.mxu1 %v675_v6 }
  0xab   : > { %v292_v24 = vpop.xlane.xlu0 %291 }
  0xac   : > { %v300_v25 = vmul.f32 %v1388_v23, %v292_v24  ;;  %v382_v24 = vld [vmem:[#allocation7] sm:$0xf] }
  0xad   : > { %v387_v33 = vperm.slane %v382_v24, 3 }
  0xae   : > { %v1391_v26 = vsub.f32 %v290_v0, %v300_v25  ;;  %v326_v0 = vld [vmem:[#allocation5 + $0x40] sm:$0xff]  ;;  %v385_v25 = vperm.slane %v382_v24, 1 }
  0xaf   : > { %405 = vmatpush.msra.mxu0 %v326_v0  ;;  %v695_v0 = vld [vmem:[#allocation8 + $0x178] sm:$0xff] }
  0xb0   : > { %v302_v27 = vmul.f32 %v1391_v26, %v1391_v26  ;;  %756 = vmatpush.msrb.mxu2 %v695_v0 }
  0xb1   : > { %406 = vmatpush.msra.mxu0 %v322_v4 }
  0xb2   : > { %303 = vadd.xlane.f32.xlu0 %v302_v27  ;;  %757 = vmatpush.msrb.mxu2 %v694_v7 }
  0xb3   : > { %407 = vmatpush.msra.mxu0 %v318_v8  ;;  %v710_v8 = vld [vmem:[#allocation8 + $0x1f0] sm:$0xff] }
  0xb4   : > { %777 = vmatpush.msrb.mxu3 %v710_v8 }
  0xb5   : > { %716 = vmatpush.msrb.mxu0 %v663_v34 }
  0xb7   : > { %717 = vmatpush.msrb.mxu0 %v662_v38  ;;  %v673_v38 = vld [vmem:[#allocation8 + $0xc8] sm:$0xff] }
  0xb9   : > { %718 = vmatpush.msrb.mxu0 %v661_v44  ;;  %v708_v44 = vld [vmem:[#allocation8 + $0x1e0] sm:$0xff] }
  0xbb   : > { %719 = vmatpush.msrb.mxu0 %v660_v59  ;;  %v691_v59 = vld [vmem:[#allocation8 + $0x158] sm:$0xff] }
  0xbd   : > { %720 = vmatpush.msrb.mxu0 %v659_v2  ;;  %v690_v2 = vld [vmem:[#allocation8 + $0x150] sm:$0xff] }
 0x125   : > { %v304_v12 = vpop.xlane.xlu0 %303 }
 0x126   : > { %v305_v13 = vmul.f32 %v304_v12, %v1388_v23  ;;  %v384_v23 = vperm.slane %v382_v24, 0 }
 0x128   : > { %v306_v14 = vadd.f32 1e-05, %v305_v13 }
 0x12a   : > { %1019 = vrsqrt.f32 %v306_v14  ;;  %vm313_vm2 = vweird.f32 %v306_v14 }
 0x130   : > { %v1020_v15 = vpop.eup %1019 }
 0x131   : > { %v308_v16 = vmul.f32 %v1020_v15, %v306_v14  ;;  %vm314_vm1 = vweird.f32 %v1020_v15 }
 0x132   : > { %vm315_vm3 = vmor %vm313_vm2, %vm314_vm1 }
 0x133   : > { %v309_v17 = vmul.f32 %v1020_v15, %v308_v16 }
 0x135   : > { %v310_v18 = vmul.f32 0.5, %v309_v17 }
 0x137   : > { %v311_v19 = vsub.f32 1.5, %v310_v18 }
 0x139   : > { %v312_v20 = vmul.f32 %v1020_v15, %v311_v19  ;;  %v658_v19 = vld [vmem:[#allocation8 + $0x50] sm:$0xff] }
 0x13a   : > { %721 = vmatpush.msrb.mxu0 %v658_v19 }
 0x13b   : > { %v316_v21 = vsel %vm315_vm3, %v1020_v15, %v312_v20  ;;  %v674_v20 = vld [vmem:[#allocation8 + $0xd0] sm:$0xff] }
 0x13c   : > { %v317_v22 = vmul.f32 %v316_v21, %v1391_v26  ;;  %v386_v26 = vperm.slane %v382_v24, 2  ;;  %v693_v21 = vld [vmem:[#allocation8 + $0x168] sm:$0xff]  ;;  %741 = vmatpush.msrb.mxu1 %v674_v20 }
 0x13d   : > { %758 = vmatpush.msrb.mxu2 %v693_v21  ;;  %v653_v20 = vld [vmem:[#allocation8 + $0x28] sm:$0xff] }
 0x13e   : > { %408 = vmatmul.f32.vlgmr.msra.gmra.mxu0 %v317_v22  ;;  %428 = vmatmul.f32.vlgmr.msra.gmra.mxu1 %v317_v22  ;;  %v669_v21 = vld [vmem:[#allocation8 + $0xa8] sm:$0xff] }
 0x13f   : > { %448 = vmatmul.f32.vlgmr.msra.gmra.mxu2 %v317_v22  ;;  %468 = vmatmul.f32.vlgmr.msra.gmra.mxu3 %v317_v22 }
 0x140   : > { %742 = vmatpush.msrb.mxu1 %v673_v38  ;;  %759 = vmatpush.msrb.mxu2 %v692_v39 }
 0x142   : > { %760 = vmatpush.msrb.mxu2 %v691_v59  ;;  %v665_v59 = vld [vmem:[#allocation8 + $0x88] sm:$0xff] }
 0x144   : > { %761 = vmatpush.msrb.mxu2 %v690_v2 }
 0x1bb   : > { %v409_v27 = vpop.f32.mrf.mxu0  ;;  %v429_v28 = vpop.f32.mrf.mxu1 }
 0x1bc   : > { %v1397_v29 = vadd.f32 %v409_v27, %v384_v23  ;;  %v1399_v30 = vadd.f32 %v429_v28, %v385_v25  ;;  %v709_v25 = vld [vmem:[#allocation8 + $0x1e8] sm:$0xff] }
 0x1bd   : > { %v657_v27 = vld [vmem:[#allocation8 + $0x48] sm:$0xff]  ;;  %778 = vmatpush.msrb.mxu3 %v709_v25  ;;  %v652_v25 = vld [vmem:[#allocation8 + $0x20] sm:$0xff] }
 0x1be   : > { %v1402_v31 = vmul.f32 0.70710677, %v1397_v29  ;;  %v1405_v32 = vmul.f32 0.70710677, %v1399_v30  ;;  %722 = vmatpush.msrb.mxu0 %v657_v27  ;;  %v668_v27 = vld [vmem:[#allocation8 + $0xa0] sm:$0xff] }
 0x1bf   : > { %779 = vmatpush.msrb.mxu3 %v708_v44  ;;  %v702_v44 = vld [vmem:[#allocation8 + $0x1b0] sm:$0xff] }
 0x1c0   : > { %v480_v36 = vmul.f32 %v1402_v31, %v1402_v31  ;;  %v520_v37 = vmul.f32 %v1405_v32, %v1405_v32  ;;  %723 = vmatpush.msrb.mxu0 %v656_v45 }
 0x1c1   : > { %780 = vmatpush.msrb.mxu3 %v707_v60 }
 0x1c2   : > { %v1411_v40 = vmin.f32 %v480_v36, 16.0  ;;  %v1413_v41 = vmin.f32 %v520_v37, 16.0  ;;  %v449_v42 = vpop.f32.mrf.mxu2  ;;  %v469_v43 = vpop.f32.mrf.mxu3 }
 0x1c3   : > { %v1415_v46 = vadd.f32 %v449_v42, %v386_v26  ;;  %v1417_v47 = vadd.f32 %v469_v43, %v387_v33 }
 0x1c4   : > { %v482_v48 = vmul.f32 2.1237322e-06, %v1411_v40  ;;  %v493_v49 = vmul.f32 3.8918573e-05, %v1411_v40  ;;  %v522_v50 = vmul.f32 2.1237322e-06, %v1413_v41 }
 0x1c5   : > { %v533_v51 = vmul.f32 3.8918573e-05, %v1413_v41  ;;  %v1424_v52 = vmul.f32 0.70710677, %v1415_v46  ;;  %v1429_v58 = vmul.f32 0.70710677, %v1417_v47 }
 0x1c6   : > { %v483_v53 = vadd.f32 0.00028619796, %v482_v48  ;;  %v494_v54 = vadd.f32 0.001143296, %v493_v49  ;;  %v523_v55 = vadd.f32 0.00028619796, %v522_v50 }
 0x1c7   : > { %v534_v56 = vadd.f32 0.001143296, %v533_v51  ;;  %v560_v57 = vmul.f32 %v1424_v52, %v1424_v52  ;;  %v600_v5 = vmul.f32 %v1429_v58, %v1429_v58  ;;  %v672_v48 = vld [vmem:[#allocation8 + $0xc0] sm:$0xff] }
 0x1c8   : > { %v484_v61 = vmul.f32 %v483_v53, %v1411_v40  ;;  %v495_v62 = vmul.f32 %v494_v54, %v1411_v40  ;;  %v524_v63 = vmul.f32 %v523_v55, %v1413_v41  ;;  %743 = vmatpush.msrb.mxu1 %v672_v48 }
 0x1c9   : > { %v535_v3 = vmul.f32 %v534_v56, %v1413_v41  ;;  %v1435_v4 = vmin.f32 %v560_v57, 16.0  ;;  %v1444_v18 = vmin.f32 %v600_v5, 16.0 }
 0x1ca   : > { %v485_v9 = vadd.f32 0.0036580483, %v484_v61  ;;  %v496_v10 = vadd.f32 0.014752088, %v495_v62  ;;  %v525_v11 = vadd.f32 0.0036580483, %v524_v63  ;;  %744 = vmatpush.msrb.mxu1 %v671_v1 }
 0x1cb   : > { %v536_v12 = vadd.f32 0.014752088, %v535_v3  ;;  %v562_v13 = vmul.f32 2.1237322e-06, %v1435_v4  ;;  %v573_v14 = vmul.f32 3.8918573e-05, %v1435_v4 }
 0x1cc   : > { %v486_v15 = vmul.f32 %v485_v9, %v1411_v40  ;;  %v497_v16 = vmul.f32 %v496_v10, %v1411_v40  ;;  %v526_v17 = vmul.f32 %v525_v11, %v1413_v41  ;;  %v602_v37 = vmul.f32 2.1237322e-06, %v1444_v18  ;;  %v655_v61 = vld [vmem:[#allocation8 + $0x38] sm:$0xff]  ;;  %v706_v3 = vld [vmem:[#allocation8 + $0x1d0] sm:$0xff] }
 0x1cd   : > { %v537_v22 = vmul.f32 %v536_v12, %v1413_v41  ;;  %v563_v24 = vadd.f32 0.00028619796, %v562_v13  ;;  %v574_v23 = vadd.f32 0.001143296, %v573_v14  ;;  %v613_v43 = vmul.f32 3.8918573e-05, %v1444_v18  ;;  %724 = vmatpush.msrb.mxu0 %v655_v61  ;;  %781 = vmatpush.msrb.mxu3 %v706_v3 }
 0x1ce   : > { %v487_v28 = vadd.f32 0.05243302, %v486_v15  ;;  %v498_v26 = vadd.f32 0.112945676, %v497_v16  ;;  %v527_v33 = vadd.f32 0.05243302, %v526_v17 }
 0x1cf   : > { %v538_v34 = vadd.f32 0.112945676, %v537_v22  ;;  %v564_v35 = vmul.f32 %v563_v24, %v1435_v4  ;;  %v575_v36 = vmul.f32 %v574_v23, %v1435_v4  ;;  %v603_v55 = vadd.f32 0.00028619796, %v602_v37  ;;  %v654_v9 = vld [vmem:[#allocation8 + $0x30] sm:$0xff]  ;;  %v689_v14 = vld [vmem:[#allocation8 + $0x148] sm:$0xff] }
 0x1d0   : > { %v499_v42 = vmul.f32 %v498_v26, %v1411_v40  ;;  %v488_v49 = vmul.f32 %v487_v28, %v1411_v40  ;;  %v528_v63 = vmul.f32 %v527_v33, %v1413_v41  ;;  %v614_v0 = vadd.f32 0.001143296, %v613_v43  ;;  %725 = vmatpush.msrb.mxu0 %v654_v9  ;;  %v670_v13 = vld [vmem:[#allocation8 + $0xb0] sm:$0xff]  ;;  %v705_v15 = vld [vmem:[#allocation8 + $0x1c8] sm:$0xff]  ;;  %762 = vmatpush.msrb.mxu2 %v689_v14  ;;  %v688_v22 = vld [vmem:[#allocation8 + $0x140] sm:$0xff] }
 0x1d1   : > { %v539_v50 = vmul.f32 %v538_v34, %v1413_v41  ;;  %v576_v51 = vadd.f32 0.014752088, %v575_v36  ;;  %v565_v54 = vadd.f32 0.0036580483, %v564_v35  ;;  %v604_v17 = vmul.f32 %v603_v55, %v1444_v18  ;;  %745 = vmatpush.msrb.mxu1 %v670_v13  ;;  %782 = vmatpush.msrb.mxu3 %v705_v15  ;;  %v704_v23 = vld [vmem:[#allocation8 + $0x1c0] sm:$0xff]  ;;  %v687_v33 = vld [vmem:[#allocation8 + $0x138] sm:$0xff] }
 0x1d2   : > { %v500_v53 = vadd.f32 0.4994258, %v499_v42  ;;  %v489_v5 = vadd.f32 0.18741608, %v488_v49  ;;  %v529_v16 = vadd.f32 0.18741608, %v528_v63  ;;  %v615_v19 = vmul.f32 %v614_v0, %v1444_v18  ;;  %726 = vmatpush.msrb.mxu0 %v653_v20  ;;  %763 = vmatpush.msrb.mxu2 %v688_v22 }
 0x1d3   : > { %v540_v56 = vadd.f32 0.4994258, %v539_v50  ;;  %v577_v57 = vmul.f32 %v576_v51, %v1435_v4  ;;  %v566_v11 = vmul.f32 %v565_v54, %v1435_v4  ;;  %746 = vmatpush.msrb.mxu1 %v669_v21  ;;  %783 = vmatpush.msrb.mxu3 %v704_v23  ;;  %v605_v35 = vadd.f32 0.0036580483, %v604_v17  ;;  %v651_v37 = vld [vmem:[#allocation8 + $0x18] sm:$0xff]  ;;  %v686_v43 = vld [vmem:[#allocation8 + $0x130] sm:$0xff] }
 0x1d4   : > { %v501_v62 = vmul.f32 %v500_v53, %v1411_v40  ;;  %v490_v24 = vmul.f32 %v489_v5, %v1411_v40  ;;  %727 = vmatpush.msrb.mxu0 %v652_v25  ;;  %v530_v34 = vmul.f32 %v529_v16, %v1413_v41  ;;  %v616_v36 = vadd.f32 0.014752088, %v615_v19  ;;  %764 = vmatpush.msrb.mxu2 %v687_v33  ;;  %v703_v40 = vld [vmem:[#allocation8 + $0x1b8] sm:$0xff]  ;;  %v666_v49 = vld [vmem:[#allocation8 + $0x90] sm:$0xff]  ;;  %v685_v50 = vld [vmem:[#allocation8 + $0x128] sm:$0xff] }
 0x1d5   : > { %v541_v6 = vmul.f32 %v540_v56, %v1413_v41  ;;  %v578_v7 = vadd.f32 0.112945676, %v577_v57  ;;  %v567_v28 = vadd.f32 0.05243302, %v566_v11  ;;  %747 = vmatpush.msrb.mxu1 %v668_v27  ;;  %784 = vmatpush.msrb.mxu3 %v703_v40  ;;  %v667_v42 = vld [vmem:[#allocation8 + $0x98] sm:$0xff]  ;;  %v650_v41 = vld [vmem:[#allocation8 + $0x10] sm:$0xff]  ;;  %v606_v3 = vmul.f32 %v605_v35, %v1444_v18 }
 0x1d6   : > { %v1458_v8 = vadd.f32 1.0, %v501_v62  ;;  %v491_v38 = vadd.f32 1.1283791, %v490_v24  ;;  %728 = vmatpush.msrb.mxu0 %v651_v37  ;;  %v617_v48 = vmul.f32 %v616_v36, %v1444_v18  ;;  %765 = vmatpush.msrb.mxu2 %v686_v43  ;;  %v701_v56 = vld [vmem:[#allocation8 + $0x1a8] sm:$0xff]  ;;  %v531_v60 = vadd.f32 1.1283791, %v530_v34 }
 0x1d7   : > { %v1460_v10 = vadd.f32 1.0, %v541_v6  ;;  %v579_v12 = vmul.f32 %v578_v7, %v1435_v4  ;;  %748 = vmatpush.msrb.mxu1 %v667_v42  ;;  %v568_v54 = vmul.f32 %v567_v28, %v1435_v4  ;;  %785 = vmatpush.msrb.mxu3 %v702_v44  ;;  %v649_v57 = vld [vmem:[#allocation8 + $0x8] sm:$0xff]  ;;  %v684_v63 = vld [vmem:[#allocation8 + $0x120] sm:$0xff]  ;;  %v683_v13 = vld [vmem:[#allocation8 + $0x118] sm:$0xff]  ;;  %v607_v25 = vadd.f32 0.05243302, %v606_v3 }
 0x1d8   : > { %1021 = vrcp.f32 %v1458_v8  ;;  %729 = vmatpush.msrb.mxu0 %v650_v41  ;;  %v618_v62 = vadd.f32 0.112945676, %v617_v48  ;;  %766 = vmatpush.msrb.mxu2 %v685_v50  ;;  %v700_v0 = vld [vmem:[#allocation8 + $0x1a0] sm:$0xff]  ;;  %v492_v1 = vmul.f32 %v491_v38, %v1402_v31  ;;  %v512_v7 = vand.u32 2147483647, %v1458_v8  ;;  %v699_v31 = vld [vmem:[#allocation8 + $0x198] sm:$0xff] }
 0x1d9   : > { %1023 = vrcp.f32 %v1460_v10  ;;  %v580_v26 = vadd.f32 0.4994258, %v579_v12  ;;  %749 = vmatpush.msrb.mxu1 %v666_v49  ;;  %786 = vmatpush.msrb.mxu3 %v701_v56  ;;  %v648_v5 = vld [vmem:[#allocation8] sm:$0xff]  ;;  %v514_v9 = vand.u32 2147483648, %v1458_v8  ;;  %v554_v15 = vand.u32 2147483648, %v1460_v10  ;;  %v682_v17 = vld [vmem:[#allocation8 + $0x110] sm:$0xff] }
 0x1da   : > { %730 = vmatpush.msrb.mxu0 %v649_v57  ;;  %v664_v6 = vld [vmem:[#allocation8 + $0x80] sm:$0xff]  ;;  %v619_v12 = vmul.f32 %v618_v62, %v1444_v18  ;;  %767 = vmatpush.msrb.mxu2 %v684_v63  ;;  %v569_v16 = vadd.f32 0.18741608, %v568_v54  ;;  %v552_v20 = vand.u32 2147483647, %v1460_v10  ;;  %v698_v22 = vld [vmem:[#allocation8 + $0x190] sm:$0xff]  ;;  %vm508_vm6 = vweird.f32 %v1458_v8 }
 0x1db   : > { %v581_v39 = vmul.f32 %v580_v26, %v1435_v4  ;;  %750 = vmatpush.msrb.mxu1 %v665_v59  ;;  %787 = vmatpush.msrb.mxu3 %v700_v0  ;;  %v532_v23 = vmul.f32 %v531_v60, %v1405_v32  ;;  %v681_v27 = vld [vmem:[#allocation8 + $0x108] sm:$0xff]  ;;  %v515_v26 = vor.u32 1.1754944e-38, %v514_v9  ;;  %vm548_vm8 = vweird.f32 %v1460_v10  ;;  %v680_v37 = vld [vmem:[#allocation8 + $0x100] sm:$0xff] }
 0x1dc   : > { %731 = vmatpush.msrb.mxu0 %v648_v5  ;;  %v620_v21 = vadd.f32 0.4994258, %v619_v12  ;;  %768 = vmatpush.msrb.mxu2 %v683_v13  ;;  %vm513_vm9 = vcmp.eq.f32.partialorder %v512_v7, 8.507059e+37  ;;  %v555_v36 = vor.u32 1.1754944e-38, %v554_v15  ;;  %v570_v40 = vmul.f32 %v569_v16, %v1435_v4  ;;  %v696_v42 = vld [vmem:[#allocation8 + $0x180] sm:$0xff] }
 0x1dd   : > { %v1479_v55 = vadd.f32 1.0, %v581_v39  ;;  %751 = vmatpush.msrb.mxu1 %v664_v6  ;;  %788 = vmatpush.msrb.mxu3 %v699_v31  ;;  %vm553_vm11 = vcmp.eq.f32.partialorder %v552_v20, 8.507059e+37  ;;  %v472_v57 = vmul.f32 0.5, %v1397_v29  ;;  %v473_v59 = vmul.f32 0.5, %v1399_v30 }
 0x1de   : > { %v1471_v45 = vpop.eup %1021  ;;  %v621_v34 = vmul.f32 %v620_v21, %v1444_v18  ;;  %769 = vmatpush.msrb.mxu2 %v682_v17  ;;  %v571_v4 = vadd.f32 1.1283791, %v570_v40  ;;  %v474_v12 = vmul.f32 0.5, %v1415_v46 }
 0x1df   : > { %v1474_v51 = vpop.eup %1023  ;;  %v504_v53 = vmul.f32 %v1471_v45, %v1458_v8  ;;  %1025 = vrcp.f32 %v1479_v55  ;;  %vm509_vm4 = vweird.f32 %v1471_v45  ;;  %v697_v8 = vld [vmem:[#allocation8 + $0x188] sm:$0xff]  ;;  %789 = vmatpush.msrb.mxu3 %v698_v22  ;;  %v592_v50 = vand.u32 2147483647, %v1479_v55 }
 0x1e0   : > { %v544_v61 = vmul.f32 %v1474_v51, %v1460_v10  ;;  %vm549_vm5 = vweird.f32 %v1474_v51  ;;  %vm1500_vm7 = vmor %vm508_vm6, %vm509_vm4  ;;  %770 = vmatpush.msrb.mxu2 %v681_v27  ;;  %v622_v48 = vadd.f32 1.0, %v621_v34  ;;  %vm588_vm13 = vweird.f32 %v1479_v55  ;;  %v1016_v27 = vld [vmem:[%s1568_s4] ss:$0 sm:$0xff] }
 0x1e1   : > { %v505_v2 = vsub.f32 1.0, %v504_v53  ;;  %vm550_vm10 = vmor %vm548_vm8, %vm549_vm5  ;;  %790 = vmatpush.msrb.mxu3 %v697_v8  ;;  %v594_v53 = vand.u32 2147483648, %v1479_v55  ;;  %v572_v0 = vmul.f32 %v571_v4, %v1424_v52  ;;  %vm593_vm15 = vcmp.eq.f32.partialorder %v592_v50, 8.507059e+37 }
 0x1e2   : > { %v545_v11 = vsub.f32 1.0, %v544_v61  ;;  %771 = vmatpush.msrb.mxu2 %v680_v37  ;;  %1027 = vrcp.f32 %v622_v48  ;;  %v634_v52 = vand.u32 2147483648, %v622_v48  ;;  %vm628_vm1 = vweird.f32 %v622_v48 }
 0x1e3   : > { %v506_v14 = vmul.f32 %v1471_v45, %v505_v2  ;;  %791 = vmatpush.msrb.mxu3 %v696_v42 }
 0x1e4   : > { %v546_v19 = vmul.f32 %v1474_v51, %v545_v11 }
 0x1e5   : > { %v507_v24 = vadd.f32 %v1471_v45, %v506_v14  ;;  %v1026_v35 = vpop.eup %1025  ;;  %v632_v14 = vand.u32 2147483647, %v622_v48 }
 0x1e6   : > { %v547_v33 = vadd.f32 %v1474_v51, %v546_v19  ;;  %v584_v39 = vmul.f32 %v1026_v35, %v1479_v55  ;;  %vm589_vm12 = vweird.f32 %v1026_v35 }
 0x1e7   : > { %v511_v32 = vsel %vm1500_vm7, %v1471_v45, %v507_v24  ;;  %v608_v45 = vmul.f32 %v607_v25, %v1444_v18  ;;  %vm590_vm14 = vmor %vm588_vm13, %vm589_vm12  ;;  %vm633_vm3 = vcmp.eq.f32.partialorder %v632_v14, 8.507059e+37  ;;  %v475_v24 = vmul.f32 0.5, %v1417_v47 }
 0x1e8   : > { %v516_v38 = vsel %vm513_vm9, %v515_v26, %v511_v32  ;;  %v551_v10 = vsel %vm550_vm10, %v1474_v51, %v547_v33  ;;  %v585_v49 = vsub.f32 1.0, %v584_v39  ;;  %v1028_v6 = vpop.eup %1027 }
 0x1e9   : > { %v517_v43 = vmul.f32 %v516_v38, %v492_v1  ;;  %v556_v44 = vsel %vm553_vm11, %v555_v36, %v551_v10  ;;  %v609_v60 = vadd.f32 0.18741608, %v608_v45  ;;  %v595_v1 = vor.u32 1.1754944e-38, %v594_v53 }
 0x1ea   : > { %v557_v41 = vmul.f32 %v556_v44, %v532_v23  ;;  %v586_v51 = vmul.f32 %v1026_v35, %v585_v49  ;;  %v624_v30 = vmul.f32 %v1028_v6, %v622_v48  ;;  %vm629_vm0 = vweird.f32 %v1028_v6 }
 0x1eb   : > { %v926_v54 = vclamps-f32 %v517_v43, 1.0  ;;  %v610_v29 = vmul.f32 %v609_v60, %v1444_v18  ;;  %vm630_vm2 = vmor %vm628_vm1, %vm629_vm0  ;;  %v635_v18 = vor.u32 1.1754944e-38, %v634_v52 }
 0x1ec   : > { %v927_v56 = vclamps-f32 %v557_v41, 1.0  ;;  %v587_v61 = vadd.f32 %v1026_v35, %v586_v51  ;;  %v625_v11 = vsub.f32 1.0, %v624_v30 }
 0x1ed   : > { %v640_v62 = vadd.f32 1.0, %v926_v54  ;;  %v611_v13 = vadd.f32 1.1283791, %v610_v29 }
 0x1ee   : > { %v641_v63 = vadd.f32 1.0, %v927_v56  ;;  %v591_v2 = vsel %vm590_vm14, %v1026_v35, %v587_v61  ;;  %v626_v31 = vmul.f32 %v1028_v6, %v625_v11 }
 0x1ef   : > { %v644_v3 = vmul.f32 %v640_v62, %v472_v57  ;;  %v596_v7 = vsel %vm593_vm15, %v595_v1, %v591_v2  ;;  %v612_v19 = vmul.f32 %v611_v13, %v1429_v58 }
 0x1f0   : > { %v645_v5 = vmul.f32 %v641_v63, %v473_v59  ;;  %v597_v9 = vmul.f32 %v596_v7, %v572_v0  ;;  %v627_v16 = vadd.f32 %v1028_v6, %v626_v31 }
 0x1f1   : > { %732 = vmatmul.f32.vlgmr.msrb.gmra.mxu0 %v644_v3 }
 0x1f2   : > { %752 = vmatmul.f32.vlgmr.msrb.gmra.mxu1 %v645_v5  ;;  %v928_v55 = vclamps-f32 %v597_v9, 1.0  ;;  %v631_v20 = vsel %vm630_vm2, %v1028_v6, %v627_v16 }
 0x1f3   : > { %v636_v21 = vsel %vm633_vm3, %v635_v18, %v631_v20 }
 0x1f4   : > { %v642_v15 = vadd.f32 1.0, %v928_v55  ;;  %v637_v46 = vmul.f32 %v636_v21, %v612_v19 }
 0x1f6   : > { %v646_v17 = vmul.f32 %v642_v15, %v474_v12  ;;  %v929_v22 = vclamps-f32 %v637_v46, 1.0 }
 0x1f8   : > { %772 = vmatmul.f32.vlgmr.msrb.gmra.mxu2 %v646_v17  ;;  %v643_v23 = vadd.f32 1.0, %v929_v22 }
 0x1fa   : > { %v647_v25 = vmul.f32 %v643_v23, %v475_v24 }
 0x1fc   : > { %792 = vmatmul.f32.vlgmr.msrb.gmra.mxu3 %v647_v25 }
 0x26e   : > { %v733_v28 = vpop.f32.mrf.mxu0 }
 0x26f   : > { %v734_v26 = vadd.f32 %v1016_v27, %v733_v28  ;;  %v753_v58 = vpop.f32.mrf.mxu1 }
 0x271   : > { %v754_v34 = vadd.f32 %v753_v58, %v734_v26 }
 0x27b   : > { %v773_v33 = vpop.f32.mrf.mxu2 }
 0x27c   : > { %v774_v47 = vadd.f32 %v773_v33, %v754_v34 }
 0x27f   : > { %v793_v8 = vpop.f32.mrf.mxu3 }
 0x280   : > { %v794_v35 = vadd.f32 %v793_v8, %v774_v47 }
 0x282   : > { %796 = vst [vmem:[%s289_s27] sm:$0xff] %v794_v35 }
 0x283   : > { %1176 = shalt.err (!%p1173_p9)
}
 0x284   : > { %948 = dma.vmem_to_hbm [thread:$0]  (%p1339_p13), %s811_s28, 128, %s813_s10, %s798_s9  }
 0x285 PF: > { %s824_s7 = sand.u32 1, %s1211_s18   ;;  %p1578_p10 = scmp.ge.s32.totalorder %s1223_s21, 2 }
 0x286   : > { %s825_s30 = scalar_lea.sflag [#allocation4], %s824_s7 }
 0x287   : > { %p965_p11 = pnand %p1578_p10, %p1344_p4 }
 0x289   : > { %p966_p0 = pneg %p965_p11 }
 0x28b   : > { %1206 = dma.done.wait (%p966_p0), %s825_s30, 128  }
 0x28c   : > { %1208 = vsyncadd (%p966_p0), %s825_s30, 4294967168  ;;  %p20_p2 = scmp.ge.s32.totalorder %s1319_s24, 4   ;;  %s1579_s18 = smov %s1215_s19 }
 0x28d   : > { %s1580_s19 = smov %s1219_s20  ;;  %s1581_s20 = smov %s1331_s29 }
 0x28e   : > { %s1582_s21 = smov %s1319_s24  ;;  %22 = sbr.rel (!%p20_p2) target bundleno = 7 (0x7), region = 97 }
 0x293   :  { %831 = vsyncpa [#allocation3], 1 }
 0x294   :  { %833 = vsyncpa [#allocation3 + $0x1], 1 }
 0x295   :  { %834 = vsyncpa [#allocation6], 1 }
 0x296   :  { %835 = vsyncpa [#allocation9], 1 }
 0x297   :  { %836 = vsyncpa [#allocation4], 1 }
 0x298   :  { %838 = vsyncpa [#allocation4 + $0x1], 1 }

</bundles_post_ra>
